<compile_context>
chip_gen: v5e
topology: v5e:2x2
jax: 0.10.0
libtpu: 0.0.40
codegen_flags: <defaults>
</compile_context>

<pallas_src>
import math

import jax
import jax.numpy as jnp
from jax import lax
from jax.experimental import pallas as pl
from jax.experimental.pallas import tpu as pltpu

EPS = 1e-5


def _stats2d(x):
    """Single-pass (mean, biased variance) over all elements of a 2-D tile."""
    mu = jnp.mean(x, axis=(0, 1), keepdims=True)
    m2 = jnp.mean(x * x, axis=(0, 1), keepdims=True)
    return mu, jnp.maximum(m2 - mu * mu, 0.0)


def _prologue_kernel(e1_ref, rel_ref, wfc_ref, vecp_ref, convp_ref, bn0p_ref,
                     fc_ref, taps_ref, acc_ref):
    """tanh -> bn0 -> conv1d -> bn1 -> ReLU -> fc -> bn2 -> ReLU (grid over C)."""
    c = pl.program_id(0)
    C = pl.num_programs(0)
    B, D = e1_ref.shape
    K2 = taps_ref.shape[0]          # 2 * K
    K = K2 // 2
    pad = K // 2

    @pl.when(c == 0)
    def _init():
        # tanh of the gathered entity rows (fused here, not in XLA).
        e1 = jnp.tanh(e1_ref[...])
        rel = rel_ref[...]
        # ---- bn0 (BatchNorm1d(2)): per channel over (batch, length) ----
        mu0, var0 = _stats2d(e1)
        mu1, var1 = _stats2d(rel)
        s0 = (e1 - mu0) * lax.rsqrt(var0 + EPS) * bn0p_ref[0, 0] + bn0p_ref[0, 1]
        s1 = (rel - mu1) * lax.rsqrt(var1 + EPS) * bn0p_ref[1, 0] + bn0p_ref[1, 1]
        # input_dropout p=0 -> identity
        # ---- 2*K shifted tap maps (zero-padded conv taps): XLU roll + mask ----
        # taps[idx][:, d] = x[:, d + off], off = k - pad, zero outside [0, D).
        d_idx = lax.broadcasted_iota(jnp.int32, (B, D), 1)
        idx = 0
        for x in (s0, s1):                          # ic = 0 (entity), 1 (relation)
            for k in range(K):
                off = k - pad
                if off == 0:
                    taps_ref[idx] = x
                else:
                    rolled = pltpu.roll(x, (-off) % D, 1)     # jnp.roll semantics
                    valid = (d_idx + off >= 0) & (d_idx + off < D)
                    taps_ref[idx] = jnp.where(valid, rolled, 0.0)
                idx += 1
        acc_ref[...] = jnp.zeros_like(acc_ref)

    # ---- this grid step's channel: conv taps -> bn1 -> ReLU -> fc accumulate ----
    # convp_ref row c layout: [w(c,0,0..K-1), w(c,1,0..K-1), conv_b, bn1_g, bn1_b]
    conv_c = taps_ref[0] * convp_ref[c, 0]
    for j in range(1, K2):
        conv_c = conv_c + taps_ref[j] * convp_ref[c, j]
    conv_c = conv_c + convp_ref[c, K2]                         # conv bias
    mu, var = _stats2d(conv_c)
    h = (conv_c - mu) * lax.rsqrt(var + EPS) * convp_ref[c, K2 + 1] \
        + convp_ref[c, K2 + 2]                                 # bn1
    h = jnp.maximum(h, 0.0)                                    # ReLU; fmap dropout p=0
    acc_ref[...] += jnp.dot(h, wfc_ref[0], preferred_element_type=jnp.float32)

    @pl.when(c == C - 1)
    def _finalize():
        fc = acc_ref[...] + vecp_ref[0:1, :]                   # fc bias; hidden drop p=0
        # bn2 (BatchNorm1d(D)) over the batch axis (B > 1 branch) + ReLU.
        mu2 = jnp.mean(fc, axis=0, keepdims=True)
        var2 = jnp.mean(fc * fc, axis=0, keepdims=True) - mu2 * mu2
        fc = ((fc - mu2) * lax.rsqrt(jnp.maximum(var2, 0.0) + EPS)
              * vecp_ref[1:2, :] + vecp_ref[2:3, :])
        fc_ref[...] = jnp.maximum(fc, 0.0)


def _score_kernel(fc_ref, emb_ref, out_ref, temb_ref):
    """One (TILE_B, TILE_E) tile of fc @ tanh(embedding)^T, tanh fused per tile."""
    @pl.when(pl.program_id(1) == 0)
    def _():
        # tanh computed in f32 (v5e EUP has no bf16 path), then cast once per
        # E tile; stays resident in VMEM across the inner B loop.
        temb_ref[...] = jnp.tanh(emb_ref[...]).astype(temb_ref.dtype)
    out_ref[...] = lax.dot_general(
        fc_ref[...], temb_ref[...],
        dimension_numbers=(((1,), (1,)), ((), ())),
        preferred_element_type=jnp.float32)


def conv_transe_forward(params, embedding, emb_rel, triplets,
                        score_dtype=jnp.bfloat16):
    """Gather / parameter packing (XLA glue) + two Pallas kernel calls."""
    B = triplets.shape[0]
    E, D = embedding.shape
    C, _, K = params["conv_w"].shape
    assert B > 1, "bn2 branch of the reference forward requires batch_size > 1"

    # Gather RAW rows; tanh of e1 rows happens inside the prologue kernel and
    # tanh of the full table happens per-tile inside the score kernel.
    e1_raw = embedding[triplets[:, 0]]                 # (B, D)
    rel = emb_rel[triplets[:, 1]]                      # (B, D)

    # ---- packed small parameters ----
    conv_pack = jnp.concatenate(
        [params["conv_w"].reshape(C, 2 * K),
         params["conv_b"][:, None],
         params["bn1_g"][:, None],
         params["bn1_b"][:, None]], axis=1).astype(jnp.float32)     # (C, 2K+3)
    bn0_pack = jnp.stack([params["bn0_g"], params["bn0_b"]],
                         axis=1).astype(jnp.float32)                 # (2, 2)
    vec_pack = jnp.stack([params["fc_b"], params["bn2_g"], params["bn2_b"]],
                         axis=0).astype(jnp.float32)                 # (3, D)
    # fc.weight is (D_out, C*D_in) with flat input index c*D + d -> (C, D_in, D_out)
    wfc = jnp.transpose(params["fc_w"].reshape(D, C, D), (1, 2, 0))  # (C, D, D)

    # ---- kernel 1: prologue, gridded over channels (wfc streamed per channel) ----
    prologue_live = 4 * (2 * B * D + 2 * D * D + 3 * D + 2 * K * B * D + 2 * B * D)
    vmem_prologue = int(min(max(4 * prologue_live, 8 << 20), 32 << 20))
    fc = pl.pallas_call(
        _prologue_kernel,
        out_shape=jax.ShapeDtypeStruct((B, D), jnp.float32),
        grid=(C,),
        in_specs=[
            pl.BlockSpec((B, D), lambda c: (0, 0)),                 # e1 raw rows
            pl.BlockSpec((B, D), lambda c: (0, 0)),                 # rel rows
            pl.BlockSpec((1, D, D), lambda c: (c, 0, 0)),           # wfc channel slab
            pl.BlockSpec((3, D), lambda c: (0, 0)),                 # fc_b / bn2 g,b
            pl.BlockSpec(memory_space=pltpu.MemorySpace.SMEM),      # conv/bn1 scalars
            pl.BlockSpec(memory_space=pltpu.MemorySpace.SMEM),      # bn0 scalars
        ],
        out_specs=pl.BlockSpec((B, D), lambda c: (0, 0)),           # resident across c
        scratch_shapes=[pltpu.VMEM((2 * K, B, D), jnp.float32),     # conv taps
                        pltpu.VMEM((B, D), jnp.float32)],           # fc accumulator
        compiler_params=pltpu.CompilerParams(
            dimension_semantics=("arbitrary",),
            vmem_limit_bytes=vmem_prologue),
    )(e1_raw, rel, wfc, vec_pack, conv_pack, bn0_pack)

    # ---- kernel 2: score matmul, grid (E tiles outer, B tiles inner) ----
    TILE_E = E if E <= 2048 else 2048          # multiple of 128 (or full dim)
    TILE_B = B if B <= 256 else 256            # multiple of 8 (or full dim)
    n_e = pl.cdiv(E, TILE_E)
    n_b = pl.cdiv(B, TILE_B)

    fc_lhs = fc.astype(score_dtype)            # tiny (B, D) cast

    emb_map = lambda ie, ib: (ie, 0)
    if n_e >= 3:
        # Depth-3 buffering on the entity stream (v5e HBM-latency hiding).
        emb_spec = pl.BlockSpec((TILE_E, D), emb_map, pipeline_mode=pl.Buffered(3))
    else:
        emb_spec = pl.BlockSpec((TILE_E, D), emb_map)

    itemsize = jnp.dtype(score_dtype).itemsize
    score_live = (3 * 4 * TILE_E * D           # up to 3 f32 emb tile buffers
                  + itemsize * TILE_E * D      # tanh'd tile scratch
                  + 2 * itemsize * TILE_B * D  # fc tile buffers
                  + 2 * 4 * TILE_B * TILE_E)   # out tile buffers
    vmem_score = int(min(max(2 * score_live, 16 << 20), 32 << 20))

    scores = pl.pallas_call(
        _score_kernel,
        out_shape=jax.ShapeDtypeStruct((B, E), jnp.float32),
        grid=(n_e, n_b),
        in_specs=[
            pl.BlockSpec((TILE_B, D), lambda ie, ib: (ib, 0)),      # fc tile
            emb_spec,                                               # raw emb tile
        ],
        out_specs=pl.BlockSpec((TILE_B, TILE_E), lambda ie, ib: (ib, ie)),
        scratch_shapes=[pltpu.VMEM((TILE_E, D), score_dtype)],      # tanh'd tile
        compiler_params=pltpu.CompilerParams(
            # E axis parallel (v7x megacore splits the table); B axis arbitrary
            # because the tanh scratch is carried across it.
            dimension_semantics=("parallel", "arbitrary"),
            vmem_limit_bytes=vmem_score),
        cost_estimate=pl.CostEstimate(
            flops=2 * B * D * E,
            transcendentals=E * D,
            bytes_accessed=4 * E * D + 4 * B * E + itemsize * B * D * n_e),
    )(fc_lhs, embedding)
    return scores


def reference_forward(params, embedding, emb_rel, triplets):
    """Plain-JAX reference mirroring the PyTorch forward (train-mode BN, p=0 dropout)."""
    C, _, K = params["conv_w"].shape
    pad = K // 2
    e_all = jnp.tanh(embedding)
    e1 = e_all[triplets[:, 0]][:, None, :]
    rl = emb_rel[triplets[:, 1]][:, None, :]
    x = jnp.concatenate([e1, rl], axis=1)                       # (B, 2, D)

    def bn(x, g, b, axes, gshape):
        mu = jnp.mean(x, axis=axes, keepdims=True)
        var = jnp.mean((x - mu) ** 2, axis=axes, keepdims=True)
        return (x - mu) / jnp.sqrt(var + EPS) * g.reshape(gshape) + b.reshape(gshape)

    x = bn(x, params["bn0_g"], params["bn0_b"], (0, 2), (1, 2, 1))
    x = lax.conv_general_dilated(x, params["conv_w"], (1,), [(pad, pad)],
                                 dimension_numbers=("NCH", "OIH", "NCH"))
    x = x + params["conv_b"][None, :, None]
    x = bn(x, params["bn1_g"], params["bn1_b"], (0, 2), (1, -1, 1))
    x = jnp.maximum(x, 0.0)
    x = x.reshape(x.shape[0], -1)
    x = x @ params["fc_w"].T + params["fc_b"]
    x = bn(x, params["bn2_g"], params["bn2_b"], (0,), (1, -1))
    x = jnp.maximum(x, 0.0)
    return x @ e_all.T


if __name__ == "__main__":
    key = jax.random.PRNGKey(0)
    # entities, relations, emb_dim, channels, ksize, batch
    E, R, D, C, K, B = 1024, 32, 128, 8, 3, 16
    ks = jax.random.split(key, 16)

    embedding = (jax.random.normal(ks[0], (E, D)) * 0.5).astype(jnp.float32)
    emb_rel = (jax.random.normal(ks[1], (R, D)) * 0.5).astype(jnp.float32)
    triplets = jnp.stack([
        jax.random.randint(ks[2], (B,), 0, E),
        jax.random.randint(ks[3], (B,), 0, R),
        jax.random.randint(ks[4], (B,), 0, E),
    ], axis=1).astype(jnp.int32)

    params = dict(
        conv_w=(jax.random.normal(ks[5], (C, 2, K)) / math.sqrt(2 * K)).astype(jnp.float32),
        conv_b=(jax.random.normal(ks[6], (C,)) * 0.1).astype(jnp.float32),
        bn0_g=(1.0 + 0.1 * jax.random.normal(ks[7], (2,))).astype(jnp.float32),
        bn0_b=(0.1 * jax.random.normal(ks[8], (2,))).astype(jnp.float32),
        bn1_g=(1.0 + 0.1 * jax.random.normal(ks[9], (C,))).astype(jnp.float32),
        bn1_b=(0.1 * jax.random.normal(ks[10], (C,))).astype(jnp.float32),
        fc_w=(jax.random.normal(ks[11], (D, C * D)) / math.sqrt(C * D)).astype(jnp.float32),
        fc_b=(jax.random.normal(ks[12], (D,)) * 0.1).astype(jnp.float32),
        bn2_g=(1.0 + 0.1 * jax.random.normal(ks[13], (D,))).astype(jnp.float32),
        bn2_b=(0.1 * jax.random.normal(ks[14], (D,))).astype(jnp.float32),
        # NOTE: `self.b` (zeros(num_entities)) is registered but unused in forward.
    )

    # bf16 MXU path (production default) and f32 path (tight verification).
    out_bf16 = jax.block_until_ready(
        conv_transe_forward(params, embedding, emb_rel, triplets,
                            score_dtype=jnp.bfloat16))
    out_f32 = jax.block_until_ready(
        conv_transe_forward(params, embedding, emb_rel, triplets,
                            score_dtype=jnp.float32))

    ref = reference_forward(params, embedding, emb_rel, triplets)
    assert out_f32.shape == (B, E) and out_f32.dtype == jnp.float32
    assert out_bf16.shape == (B, E) and out_bf16.dtype == jnp.float32
    assert jnp.all(jnp.isfinite(out_f32)) and jnp.all(jnp.isfinite(out_bf16))
    assert jnp.allclose(out_f32, ref, atol=2e-3, rtol=2e-3), (
        f"f32 max abs err {float(jnp.max(jnp.abs(out_f32 - ref)))}")
    assert jnp.allclose(out_bf16, ref, atol=5e-2, rtol=5e-2), (
        f"bf16 max abs err {float(jnp.max(jnp.abs(out_bf16 - ref)))}")
    print("KERNEL_OK")
</pallas_src>

<mosaic_0001>
module attributes {stable_mosaic.version = 11 : i64} {
  func.func @_prologue_kernel(%arg0: i32, %arg1: memref<16x128xf32, #tpu.memory_space<vmem>>, %arg2: memref<16x128xf32, #tpu.memory_space<vmem>>, %arg3: memref<1x128x128xf32, #tpu.memory_space<vmem>>, %arg4: memref<3x128xf32, #tpu.memory_space<vmem>>, %arg5: memref<8x9xf32, #tpu.memory_space<smem>>, %arg6: memref<2x2xf32, #tpu.memory_space<smem>>, %arg7: memref<16x128xf32, #tpu.memory_space<vmem>>, %arg8: memref<6x16x128xf32, #tpu.memory_space<vmem>>, %arg9: memref<16x128xf32, #tpu.memory_space<vmem>>) attributes {dimension_semantics = [#tpu.dimension_semantics<arbitrary>], iteration_bounds = array<i64: 8>, scalar_prefetch = 0 : i64, scratch_operands = 2 : i64, tpu.core_type = #tpu.core_type<tc>, window_params = [{pipeline_mode = #tpu.pipeline_mode<synchronous>, transform_indices = @transform_0, window_bounds = array<i64: 16, 128>}, {pipeline_mode = #tpu.pipeline_mode<synchronous>, transform_indices = @transform_1, window_bounds = array<i64: 16, 128>}, {transform_indices = @transform_2, window_bounds = array<i64: 1, 128, 128>}, {pipeline_mode = #tpu.pipeline_mode<synchronous>, transform_indices = @transform_3, window_bounds = array<i64: 3, 128>}, {transform_indices = @transform_4, window_bounds = array<i64: 8, 9>}, {transform_indices = @transform_5, window_bounds = array<i64: 2, 2>}, {pipeline_mode = #tpu.pipeline_mode<synchronous>, transform_indices = @transform_6, window_bounds = array<i64: 16, 128>}]} {
    %c0_i32 = arith.constant 0 : i32
    %0 = arith.cmpi eq, %arg0, %c0_i32 : i32
    %1 = arith.extui %0 : i1 to i32
    %c0_i32_0 = arith.constant 0 : i32
    %2 = arith.cmpi ne, %1, %c0_i32_0 : i32
    scf.if %2 {
      %c0_34 = arith.constant 0 : index
      %c0_35 = arith.constant 0 : index
      %93 = vector.load %arg1[%c0_34, %c0_35] : memref<16x128xf32, #tpu.memory_space<vmem>>, vector<16x128xf32>
      %94 = math.tanh %93 : vector<16x128xf32>
      %c0_36 = arith.constant 0 : index
      %c0_37 = arith.constant 0 : index
      %95 = vector.load %arg2[%c0_36, %c0_37] : memref<16x128xf32, #tpu.memory_space<vmem>>, vector<16x128xf32>
      %96 = vector.shape_cast %94 : vector<16x128xf32> to vector<1x16x128xf32>
      %cst_38 = arith.constant dense<0.000000e+00> : vector<1xf32>
      %97 = vector.multi_reduction <add>, %96, %cst_38 [1, 2] : vector<1x16x128xf32> to vector<1xf32>
      %98 = vector.shape_cast %97 : vector<1xf32> to vector<1x1x1xf32>
      %99 = vector.extract %98[0, 0, 0] : f32 from vector<1x1x1xf32>
      %100 = vector.broadcast %99 : f32 to vector<1x1xf32>
      %cst_39 = arith.constant 2.048000e+03 : f32
      %101 = vector.broadcast %cst_39 : f32 to vector<1x1xf32>
      %102 = arith.divf %100, %101 : vector<1x1xf32>
      %103 = arith.mulf %94, %94 : vector<16x128xf32>
      %104 = vector.shape_cast %103 : vector<16x128xf32> to vector<1x16x128xf32>
      %cst_40 = arith.constant dense<0.000000e+00> : vector<1xf32>
      %105 = vector.multi_reduction <add>, %104, %cst_40 [1, 2] : vector<1x16x128xf32> to vector<1xf32>
      %106 = vector.shape_cast %105 : vector<1xf32> to vector<1x1x1xf32>
      %107 = vector.extract %106[0, 0, 0] : f32 from vector<1x1x1xf32>
      %108 = vector.broadcast %107 : f32 to vector<1x1xf32>
      %cst_41 = arith.constant 2.048000e+03 : f32
      %109 = vector.broadcast %cst_41 : f32 to vector<1x1xf32>
      %110 = arith.divf %108, %109 : vector<1x1xf32>
      %111 = arith.mulf %102, %102 : vector<1x1xf32>
      %112 = arith.subf %110, %111 : vector<1x1xf32>
      %cst_42 = arith.constant 0.000000e+00 : f32
      %113 = vector.broadcast %cst_42 : f32 to vector<1x1xf32>
      %114 = arith.maximumf %112, %113 : vector<1x1xf32>
      %115 = vector.shape_cast %95 : vector<16x128xf32> to vector<1x16x128xf32>
      %cst_43 = arith.constant dense<0.000000e+00> : vector<1xf32>
      %116 = vector.multi_reduction <add>, %115, %cst_43 [1, 2] : vector<1x16x128xf32> to vector<1xf32>
      %117 = vector.shape_cast %116 : vector<1xf32> to vector<1x1x1xf32>
      %118 = vector.extract %117[0, 0, 0] : f32 from vector<1x1x1xf32>
      %119 = vector.broadcast %118 : f32 to vector<1x1xf32>
      %cst_44 = arith.constant 2.048000e+03 : f32
      %120 = vector.broadcast %cst_44 : f32 to vector<1x1xf32>
      %121 = arith.divf %119, %120 : vector<1x1xf32>
      %122 = arith.mulf %95, %95 : vector<16x128xf32>
      %123 = vector.shape_cast %122 : vector<16x128xf32> to vector<1x16x128xf32>
      %cst_45 = arith.constant dense<0.000000e+00> : vector<1xf32>
      %124 = vector.multi_reduction <add>, %123, %cst_45 [1, 2] : vector<1x16x128xf32> to vector<1xf32>
      %125 = vector.shape_cast %124 : vector<1xf32> to vector<1x1x1xf32>
      %126 = vector.extract %125[0, 0, 0] : f32 from vector<1x1x1xf32>
      %127 = vector.broadcast %126 : f32 to vector<1x1xf32>
      %cst_46 = arith.constant 2.048000e+03 : f32
      %128 = vector.broadcast %cst_46 : f32 to vector<1x1xf32>
      %129 = arith.divf %127, %128 : vector<1x1xf32>
      %130 = arith.mulf %121, %121 : vector<1x1xf32>
      %131 = arith.subf %129, %130 : vector<1x1xf32>
      %cst_47 = arith.constant 0.000000e+00 : f32
      %132 = vector.broadcast %cst_47 : f32 to vector<1x1xf32>
      %133 = arith.maximumf %131, %132 : vector<1x1xf32>
      %134 = vector.broadcast %102 : vector<1x1xf32> to vector<16x128xf32>
      %135 = arith.subf %94, %134 : vector<16x128xf32>
      %cst_48 = arith.constant 9.99999974E-6 : f32
      %136 = vector.broadcast %cst_48 : f32 to vector<1x1xf32>
      %137 = arith.addf %114, %136 : vector<1x1xf32>
      %138 = math.rsqrt %137 : vector<1x1xf32>
      %139 = vector.broadcast %138 : vector<1x1xf32> to vector<16x128xf32>
      %140 = arith.mulf %135, %139 : vector<16x128xf32>
      %c0_49 = arith.constant 0 : index
      %c0_50 = arith.constant 0 : index
      %141 = memref.load %arg6[%c0_49, %c0_50] : memref<2x2xf32, #tpu.memory_space<smem>>
      %142 = vector.broadcast %141 : f32 to vector<16x128xf32>
      %143 = arith.mulf %140, %142 : vector<16x128xf32>
      %c0_51 = arith.constant 0 : index
      %c1_52 = arith.constant 1 : index
      %144 = memref.load %arg6[%c0_51, %c1_52] : memref<2x2xf32, #tpu.memory_space<smem>>
      %145 = vector.broadcast %144 : f32 to vector<16x128xf32>
      %146 = arith.addf %143, %145 : vector<16x128xf32>
      %147 = vector.broadcast %121 : vector<1x1xf32> to vector<16x128xf32>
      %148 = arith.subf %95, %147 : vector<16x128xf32>
      %cst_53 = arith.constant 9.99999974E-6 : f32
      %149 = vector.broadcast %cst_53 : f32 to vector<1x1xf32>
      %150 = arith.addf %133, %149 : vector<1x1xf32>
      %151 = math.rsqrt %150 : vector<1x1xf32>
      %152 = vector.broadcast %151 : vector<1x1xf32> to vector<16x128xf32>
      %153 = arith.mulf %148, %152 : vector<16x128xf32>
      %c1_54 = arith.constant 1 : index
      %c0_55 = arith.constant 0 : index
      %154 = memref.load %arg6[%c1_54, %c0_55] : memref<2x2xf32, #tpu.memory_space<smem>>
      %155 = vector.broadcast %154 : f32 to vector<16x128xf32>
      %156 = arith.mulf %153, %155 : vector<16x128xf32>
      %c1_56 = arith.constant 1 : index
      %c1_57 = arith.constant 1 : index
      %157 = memref.load %arg6[%c1_56, %c1_57] : memref<2x2xf32, #tpu.memory_space<smem>>
      %158 = vector.broadcast %157 : f32 to vector<16x128xf32>
      %159 = arith.addf %156, %158 : vector<16x128xf32>
      %160 = tpu.iota {dimensions = array<i32: 1>} : vector<16x128xi32>
      %c1_i32 = arith.constant 1 : i32
      %161 = tpu.dynamic_rotate %146 by %c1_i32 dim 1 : vector<16x128xf32>, i32 -> vector<16x128xf32>
      %c-1_i32 = arith.constant -1 : i32
      %162 = vector.broadcast %c-1_i32 : i32 to vector<16x128xi32>
      %163 = arith.addi %160, %162 : vector<16x128xi32>
      %c0_i32_58 = arith.constant 0 : i32
      %164 = vector.broadcast %c0_i32_58 : i32 to vector<16x128xi32>
      %165 = arith.cmpi sge, %163, %164 : vector<16x128xi32>
      %c-1_i32_59 = arith.constant -1 : i32
      %166 = vector.broadcast %c-1_i32_59 : i32 to vector<16x128xi32>
      %167 = arith.addi %160, %166 : vector<16x128xi32>
      %c128_i32 = arith.constant 128 : i32
      %168 = vector.broadcast %c128_i32 : i32 to vector<16x128xi32>
      %169 = arith.cmpi slt, %167, %168 : vector<16x128xi32>
      %170 = arith.andi %165, %169 : vector<16x128xi1>
      %cst_60 = arith.constant 0.000000e+00 : f32
      %171 = vector.broadcast %cst_60 : f32 to vector<16x128xf32>
      %172 = arith.select %170, %161, %171 : vector<16x128xi1>, vector<16x128xf32>
      %c0_61 = arith.constant 0 : index
      %c0_62 = arith.constant 0 : index
      %c0_63 = arith.constant 0 : index
      %173 = vector.load %arg8[%c0_61, %c0_62, %c0_63] : memref<6x16x128xf32, #tpu.memory_space<vmem>>, vector<1x16x128xf32>
      %174 = vector.shape_cast %173 : vector<1x16x128xf32> to vector<16x128xf32>
      %175 = vector.shape_cast %172 : vector<16x128xf32> to vector<1x16x128xf32>
      tpu.vector_store %arg8[%c0_61, %c0_62, %c0_63], %175 {strides = array<i32>} : memref<6x16x128xf32, #tpu.memory_space<vmem>>, vector<1x16x128xf32>,
      %c1_64 = arith.constant 1 : index
      %c0_65 = arith.constant 0 : index
      %c0_66 = arith.constant 0 : index
      %176 = vector.load %arg8[%c1_64, %c0_65, %c0_66] : memref<6x16x128xf32, #tpu.memory_space<vmem>>, vector<1x16x128xf32>
      %177 = vector.shape_cast %176 : vector<1x16x128xf32> to vector<16x128xf32>
      %178 = vector.shape_cast %146 : vector<16x128xf32> to vector<1x16x128xf32>
      tpu.vector_store %arg8[%c1_64, %c0_65, %c0_66], %178 {strides = array<i32>} : memref<6x16x128xf32, #tpu.memory_space<vmem>>, vector<1x16x128xf32>,
      %c127_i32 = arith.constant 127 : i32
      %179 = tpu.dynamic_rotate %146 by %c127_i32 dim 1 : vector<16x128xf32>, i32 -> vector<16x128xf32>
      %c1_i32_67 = arith.constant 1 : i32
      %180 = vector.broadcast %c1_i32_67 : i32 to vector<16x128xi32>
      %181 = arith.addi %160, %180 : vector<16x128xi32>
      %c0_i32_68 = arith.constant 0 : i32
      %182 = vector.broadcast %c0_i32_68 : i32 to vector<16x128xi32>
      %183 = arith.cmpi sge, %181, %182 : vector<16x128xi32>
      %c1_i32_69 = arith.constant 1 : i32
      %184 = vector.broadcast %c1_i32_69 : i32 to vector<16x128xi32>
      %185 = arith.addi %160, %184 : vector<16x128xi32>
      %c128_i32_70 = arith.constant 128 : i32
      %186 = vector.broadcast %c128_i32_70 : i32 to vector<16x128xi32>
      %187 = arith.cmpi slt, %185, %186 : vector<16x128xi32>
      %188 = arith.andi %183, %187 : vector<16x128xi1>
      %cst_71 = arith.constant 0.000000e+00 : f32
      %189 = vector.broadcast %cst_71 : f32 to vector<16x128xf32>
      %190 = arith.select %188, %179, %189 : vector<16x128xi1>, vector<16x128xf32>
      %c2_72 = arith.constant 2 : index
      %c0_73 = arith.constant 0 : index
      %c0_74 = arith.constant 0 : index
      %191 = vector.load %arg8[%c2_72, %c0_73, %c0_74] : memref<6x16x128xf32, #tpu.memory_space<vmem>>, vector<1x16x128xf32>
      %192 = vector.shape_cast %191 : vector<1x16x128xf32> to vector<16x128xf32>
      %193 = vector.shape_cast %190 : vector<16x128xf32> to vector<1x16x128xf32>
      tpu.vector_store %arg8[%c2_72, %c0_73, %c0_74], %193 {strides = array<i32>} : memref<6x16x128xf32, #tpu.memory_space<vmem>>, vector<1x16x128xf32>,
      %c1_i32_75 = arith.constant 1 : i32
      %194 = tpu.dynamic_rotate %159 by %c1_i32_75 dim 1 : vector<16x128xf32>, i32 -> vector<16x128xf32>
      %c-1_i32_76 = arith.constant -1 : i32
      %195 = vector.broadcast %c-1_i32_76 : i32 to vector<16x128xi32>
      %196 = arith.addi %160, %195 : vector<16x128xi32>
      %c0_i32_77 = arith.constant 0 : i32
      %197 = vector.broadcast %c0_i32_77 : i32 to vector<16x128xi32>
      %198 = arith.cmpi sge, %196, %197 : vector<16x128xi32>
      %c-1_i32_78 = arith.constant -1 : i32
      %199 = vector.broadcast %c-1_i32_78 : i32 to vector<16x128xi32>
      %200 = arith.addi %160, %199 : vector<16x128xi32>
      %c128_i32_79 = arith.constant 128 : i32
      %201 = vector.broadcast %c128_i32_79 : i32 to vector<16x128xi32>
      %202 = arith.cmpi slt, %200, %201 : vector<16x128xi32>
      %203 = arith.andi %198, %202 : vector<16x128xi1>
      %cst_80 = arith.constant 0.000000e+00 : f32
      %204 = vector.broadcast %cst_80 : f32 to vector<16x128xf32>
      %205 = arith.select %203, %194, %204 : vector<16x128xi1>, vector<16x128xf32>
      %c3_81 = arith.constant 3 : index
      %c0_82 = arith.constant 0 : index
      %c0_83 = arith.constant 0 : index
      %206 = vector.load %arg8[%c3_81, %c0_82, %c0_83] : memref<6x16x128xf32, #tpu.memory_space<vmem>>, vector<1x16x128xf32>
      %207 = vector.shape_cast %206 : vector<1x16x128xf32> to vector<16x128xf32>
      %208 = vector.shape_cast %205 : vector<16x128xf32> to vector<1x16x128xf32>
      tpu.vector_store %arg8[%c3_81, %c0_82, %c0_83], %208 {strides = array<i32>} : memref<6x16x128xf32, #tpu.memory_space<vmem>>, vector<1x16x128xf32>,
      %c4_84 = arith.constant 4 : index
      %c0_85 = arith.constant 0 : index
      %c0_86 = arith.constant 0 : index
      %209 = vector.load %arg8[%c4_84, %c0_85, %c0_86] : memref<6x16x128xf32, #tpu.memory_space<vmem>>, vector<1x16x128xf32>
      %210 = vector.shape_cast %209 : vector<1x16x128xf32> to vector<16x128xf32>
      %211 = vector.shape_cast %159 : vector<16x128xf32> to vector<1x16x128xf32>
      tpu.vector_store %arg8[%c4_84, %c0_85, %c0_86], %211 {strides = array<i32>} : memref<6x16x128xf32, #tpu.memory_space<vmem>>, vector<1x16x128xf32>,
      %c127_i32_87 = arith.constant 127 : i32
      %212 = tpu.dynamic_rotate %159 by %c127_i32_87 dim 1 : vector<16x128xf32>, i32 -> vector<16x128xf32>
      %c1_i32_88 = arith.constant 1 : i32
      %213 = vector.broadcast %c1_i32_88 : i32 to vector<16x128xi32>
      %214 = arith.addi %160, %213 : vector<16x128xi32>
      %c0_i32_89 = arith.constant 0 : i32
      %215 = vector.broadcast %c0_i32_89 : i32 to vector<16x128xi32>
      %216 = arith.cmpi sge, %214, %215 : vector<16x128xi32>
      %c1_i32_90 = arith.constant 1 : i32
      %217 = vector.broadcast %c1_i32_90 : i32 to vector<16x128xi32>
      %218 = arith.addi %160, %217 : vector<16x128xi32>
      %c128_i32_91 = arith.constant 128 : i32
      %219 = vector.broadcast %c128_i32_91 : i32 to vector<16x128xi32>
      %220 = arith.cmpi slt, %218, %219 : vector<16x128xi32>
      %221 = arith.andi %216, %220 : vector<16x128xi1>
      %cst_92 = arith.constant 0.000000e+00 : f32
      %222 = vector.broadcast %cst_92 : f32 to vector<16x128xf32>
      %223 = arith.select %221, %212, %222 : vector<16x128xi1>, vector<16x128xf32>
      %c5_93 = arith.constant 5 : index
      %c0_94 = arith.constant 0 : index
      %c0_95 = arith.constant 0 : index
      %224 = vector.load %arg8[%c5_93, %c0_94, %c0_95] : memref<6x16x128xf32, #tpu.memory_space<vmem>>, vector<1x16x128xf32>
      %225 = vector.shape_cast %224 : vector<1x16x128xf32> to vector<16x128xf32>
      %226 = vector.shape_cast %223 : vector<16x128xf32> to vector<1x16x128xf32>
      tpu.vector_store %arg8[%c5_93, %c0_94, %c0_95], %226 {strides = array<i32>} : memref<6x16x128xf32, #tpu.memory_space<vmem>>, vector<1x16x128xf32>,
      %cst_96 = arith.constant 0.000000e+00 : f32
      %227 = vector.broadcast %cst_96 : f32 to vector<16x128xf32>
      %c0_97 = arith.constant 0 : index
      %c0_98 = arith.constant 0 : index
      %228 = vector.load %arg9[%c0_97, %c0_98] : memref<16x128xf32, #tpu.memory_space<vmem>>, vector<16x128xf32>
      tpu.vector_store %arg9[%c0_97, %c0_98], %227 {strides = array<i32>} : memref<16x128xf32, #tpu.memory_space<vmem>>, vector<16x128xf32>,
    } else {
    }
    %c0 = arith.constant 0 : index
    %c0_1 = arith.constant 0 : index
    %c0_2 = arith.constant 0 : index
    %3 = vector.load %arg8[%c0, %c0_1, %c0_2] : memref<6x16x128xf32, #tpu.memory_space<vmem>>, vector<1x16x128xf32>
    %4 = vector.shape_cast %3 : vector<1x16x128xf32> to vector<16x128xf32>
    %5 = arith.index_cast %arg0 : i32 to index
    %c0_3 = arith.constant 0 : index
    %6 = memref.load %arg5[%5, %c0_3] : memref<8x9xf32, #tpu.memory_space<smem>>
    %7 = vector.broadcast %6 : f32 to vector<16x128xf32>
    %8 = arith.mulf %4, %7 : vector<16x128xf32>
    %c1 = arith.constant 1 : index
    %c0_4 = arith.constant 0 : index
    %c0_5 = arith.constant 0 : index
    %9 = vector.load %arg8[%c1, %c0_4, %c0_5] : memref<6x16x128xf32, #tpu.memory_space<vmem>>, vector<1x16x128xf32>
    %10 = vector.shape_cast %9 : vector<1x16x128xf32> to vector<16x128xf32>
    %11 = arith.index_cast %arg0 : i32 to index
    %c1_6 = arith.constant 1 : index
    %12 = memref.load %arg5[%11, %c1_6] : memref<8x9xf32, #tpu.memory_space<smem>>
    %13 = vector.broadcast %12 : f32 to vector<16x128xf32>
    %14 = arith.mulf %10, %13 : vector<16x128xf32>
    %15 = arith.addf %8, %14 : vector<16x128xf32>
    %c2 = arith.constant 2 : index
    %c0_7 = arith.constant 0 : index
    %c0_8 = arith.constant 0 : index
    %16 = vector.load %arg8[%c2, %c0_7, %c0_8] : memref<6x16x128xf32, #tpu.memory_space<vmem>>, vector<1x16x128xf32>
    %17 = vector.shape_cast %16 : vector<1x16x128xf32> to vector<16x128xf32>
    %18 = arith.index_cast %arg0 : i32 to index
    %c2_9 = arith.constant 2 : index
    %19 = memref.load %arg5[%18, %c2_9] : memref<8x9xf32, #tpu.memory_space<smem>>
    %20 = vector.broadcast %19 : f32 to vector<16x128xf32>
    %21 = arith.mulf %17, %20 : vector<16x128xf32>
    %22 = arith.addf %15, %21 : vector<16x128xf32>
    %c3 = arith.constant 3 : index
    %c0_10 = arith.constant 0 : index
    %c0_11 = arith.constant 0 : index
    %23 = vector.load %arg8[%c3, %c0_10, %c0_11] : memref<6x16x128xf32, #tpu.memory_space<vmem>>, vector<1x16x128xf32>
    %24 = vector.shape_cast %23 : vector<1x16x128xf32> to vector<16x128xf32>
    %25 = arith.index_cast %arg0 : i32 to index
    %c3_12 = arith.constant 3 : index
    %26 = memref.load %arg5[%25, %c3_12] : memref<8x9xf32, #tpu.memory_space<smem>>
    %27 = vector.broadcast %26 : f32 to vector<16x128xf32>
    %28 = arith.mulf %24, %27 : vector<16x128xf32>
    %29 = arith.addf %22, %28 : vector<16x128xf32>
    %c4 = arith.constant 4 : index
    %c0_13 = arith.constant 0 : index
    %c0_14 = arith.constant 0 : index
    %30 = vector.load %arg8[%c4, %c0_13, %c0_14] : memref<6x16x128xf32, #tpu.memory_space<vmem>>, vector<1x16x128xf32>
    %31 = vector.shape_cast %30 : vector<1x16x128xf32> to vector<16x128xf32>
    %32 = arith.index_cast %arg0 : i32 to index
    %c4_15 = arith.constant 4 : index
    %33 = memref.load %arg5[%32, %c4_15] : memref<8x9xf32, #tpu.memory_space<smem>>
    %34 = vector.broadcast %33 : f32 to vector<16x128xf32>
    %35 = arith.mulf %31, %34 : vector<16x128xf32>
    %36 = arith.addf %29, %35 : vector<16x128xf32>
    %c5 = arith.constant 5 : index
    %c0_16 = arith.constant 0 : index
    %c0_17 = arith.constant 0 : index
    %37 = vector.load %arg8[%c5, %c0_16, %c0_17] : memref<6x16x128xf32, #tpu.memory_space<vmem>>, vector<1x16x128xf32>
    %38 = vector.shape_cast %37 : vector<1x16x128xf32> to vector<16x128xf32>
    %39 = arith.index_cast %arg0 : i32 to index
    %c5_18 = arith.constant 5 : index
    %40 = memref.load %arg5[%39, %c5_18] : memref<8x9xf32, #tpu.memory_space<smem>>
    %41 = vector.broadcast %40 : f32 to vector<16x128xf32>
    %42 = arith.mulf %38, %41 : vector<16x128xf32>
    %43 = arith.addf %36, %42 : vector<16x128xf32>
    %44 = arith.index_cast %arg0 : i32 to index
    %c6 = arith.constant 6 : index
    %45 = memref.load %arg5[%44, %c6] : memref<8x9xf32, #tpu.memory_space<smem>>
    %46 = vector.broadcast %45 : f32 to vector<16x128xf32>
    %47 = arith.addf %43, %46 : vector<16x128xf32>
    %48 = vector.shape_cast %47 : vector<16x128xf32> to vector<1x16x128xf32>
    %cst = arith.constant dense<0.000000e+00> : vector<1xf32>
    %49 = vector.multi_reduction <add>, %48, %cst [1, 2] : vector<1x16x128xf32> to vector<1xf32>
    %50 = vector.shape_cast %49 : vector<1xf32> to vector<1x1x1xf32>
    %51 = vector.extract %50[0, 0, 0] : f32 from vector<1x1x1xf32>
    %52 = vector.broadcast %51 : f32 to vector<1x1xf32>
    %cst_19 = arith.constant 2.048000e+03 : f32
    %53 = vector.broadcast %cst_19 : f32 to vector<1x1xf32>
    %54 = arith.divf %52, %53 : vector<1x1xf32>
    %55 = arith.mulf %47, %47 : vector<16x128xf32>
    %56 = vector.shape_cast %55 : vector<16x128xf32> to vector<1x16x128xf32>
    %cst_20 = arith.constant dense<0.000000e+00> : vector<1xf32>
    %57 = vector.multi_reduction <add>, %56, %cst_20 [1, 2] : vector<1x16x128xf32> to vector<1xf32>
    %58 = vector.shape_cast %57 : vector<1xf32> to vector<1x1x1xf32>
    %59 = vector.extract %58[0, 0, 0] : f32 from vector<1x1x1xf32>
    %60 = vector.broadcast %59 : f32 to vector<1x1xf32>
    %cst_21 = arith.constant 2.048000e+03 : f32
    %61 = vector.broadcast %cst_21 : f32 to vector<1x1xf32>
    %62 = arith.divf %60, %61 : vector<1x1xf32>
    %63 = arith.mulf %54, %54 : vector<1x1xf32>
    %64 = arith.subf %62, %63 : vector<1x1xf32>
    %cst_22 = arith.constant 0.000000e+00 : f32
    %65 = vector.broadcast %cst_22 : f32 to vector<1x1xf32>
    %66 = arith.maximumf %64, %65 : vector<1x1xf32>
    %67 = vector.broadcast %54 : vector<1x1xf32> to vector<16x128xf32>
    %68 = arith.subf %47, %67 : vector<16x128xf32>
    %cst_23 = arith.constant 9.99999974E-6 : f32
    %69 = vector.broadcast %cst_23 : f32 to vector<1x1xf32>
    %70 = arith.addf %66, %69 : vector<1x1xf32>
    %71 = math.rsqrt %70 : vector<1x1xf32>
    %72 = vector.broadcast %71 : vector<1x1xf32> to vector<16x128xf32>
    %73 = arith.mulf %68, %72 : vector<16x128xf32>
    %74 = arith.index_cast %arg0 : i32 to index
    %c7 = arith.constant 7 : index
    %75 = memref.load %arg5[%74, %c7] : memref<8x9xf32, #tpu.memory_space<smem>>
    %76 = vector.broadcast %75 : f32 to vector<16x128xf32>
    %77 = arith.mulf %73, %76 : vector<16x128xf32>
    %78 = arith.index_cast %arg0 : i32 to index
    %c8 = arith.constant 8 : index
    %79 = memref.load %arg5[%78, %c8] : memref<8x9xf32, #tpu.memory_space<smem>>
    %80 = vector.broadcast %79 : f32 to vector<16x128xf32>
    %81 = arith.addf %77, %80 : vector<16x128xf32>
    %cst_24 = arith.constant 0.000000e+00 : f32
    %82 = vector.broadcast %cst_24 : f32 to vector<16x128xf32>
    %83 = arith.maximumf %81, %82 : vector<16x128xf32>
    %c0_25 = arith.constant 0 : index
    %c0_26 = arith.constant 0 : index
    %84 = vector.load %arg9[%c0_25, %c0_26] : memref<16x128xf32, #tpu.memory_space<vmem>>, vector<16x128xf32>
    %c0_27 = arith.constant 0 : index
    %c0_28 = arith.constant 0 : index
    %c0_29 = arith.constant 0 : index
    %85 = vector.load %arg3[%c0_27, %c0_28, %c0_29] : memref<1x128x128xf32, #tpu.memory_space<vmem>>, vector<1x128x128xf32>
    %86 = vector.shape_cast %85 : vector<1x128x128xf32> to vector<128x128xf32>
    %cst_30 = arith.constant dense<0.000000e+00> : vector<16x128xf32>
    %87 = tpu.matmul %83, %86, %cst_30 {dimension_numbers = #tpu.dot_dimension_numbers<[1], [0], [0], [1], [0, 0, 1, 1], [], []>} : vector<16x128xf32>, vector<128x128xf32>, vector<16x128xf32> -> vector<16x128xf32>
    %88 = arith.addf %84, %87 : vector<16x128xf32>
    %c0_31 = arith.constant 0 : index
    %c0_32 = arith.constant 0 : index
    %89 = vector.load %arg9[%c0_31, %c0_32] : memref<16x128xf32, #tpu.memory_space<vmem>>, vector<16x128xf32>
    tpu.vector_store %arg9[%c0_31, %c0_32], %88 {strides = array<i32>} : memref<16x128xf32, #tpu.memory_space<vmem>>, vector<16x128xf32>,
    %c7_i32 = arith.constant 7 : i32
    %90 = arith.cmpi eq, %arg0, %c7_i32 : i32
    %91 = arith.extui %90 : i1 to i32
    %c0_i32_33 = arith.constant 0 : i32
    %92 = arith.cmpi ne, %91, %c0_i32_33 : i32
    scf.if %92 {
      %c0_34 = arith.constant 0 : index
      %c0_35 = arith.constant 0 : index
      %93 = vector.load %arg9[%c0_34, %c0_35] : memref<16x128xf32, #tpu.memory_space<vmem>>, vector<16x128xf32>
      %c0_36 = arith.constant 0 : index
      %c0_37 = arith.constant 0 : index
      %94 = vector.load %arg4[%c0_36, %c0_37] : memref<3x128xf32, #tpu.memory_space<vmem>>, vector<1x128xf32>
      %95 = vector.broadcast %94 : vector<1x128xf32> to vector<16x128xf32>
      %96 = arith.addf %93, %95 : vector<16x128xf32>
      %cst_38 = arith.constant dense<0.000000e+00> : vector<128xf32>
      %97 = vector.multi_reduction <add>, %96, %cst_38 [0] : vector<16x128xf32> to vector<128xf32>
      %98 = vector.shape_cast %97 : vector<128xf32> to vector<1x128xf32>
      %cst_39 = arith.constant 1.600000e+01 : f32
      %99 = vector.broadcast %cst_39 : f32 to vector<1x128xf32>
      %100 = arith.divf %98, %99 : vector<1x128xf32>
      %101 = arith.mulf %96, %96 : vector<16x128xf32>
      %cst_40 = arith.constant dense<0.000000e+00> : vector<128xf32>
      %102 = vector.multi_reduction <add>, %101, %cst_40 [0] : vector<16x128xf32> to vector<128xf32>
      %103 = vector.shape_cast %102 : vector<128xf32> to vector<1x128xf32>
      %cst_41 = arith.constant 1.600000e+01 : f32
      %104 = vector.broadcast %cst_41 : f32 to vector<1x128xf32>
      %105 = arith.divf %103, %104 : vector<1x128xf32>
      %106 = arith.mulf %100, %100 : vector<1x128xf32>
      %107 = arith.subf %105, %106 : vector<1x128xf32>
      %108 = vector.broadcast %100 : vector<1x128xf32> to vector<16x128xf32>
      %109 = arith.subf %96, %108 : vector<16x128xf32>
      %cst_42 = arith.constant 0.000000e+00 : f32
      %110 = vector.broadcast %cst_42 : f32 to vector<1x128xf32>
      %111 = arith.maximumf %107, %110 : vector<1x128xf32>
      %cst_43 = arith.constant 9.99999974E-6 : f32
      %112 = vector.broadcast %cst_43 : f32 to vector<1x128xf32>
      %113 = arith.addf %111, %112 : vector<1x128xf32>
      %114 = math.rsqrt %113 : vector<1x128xf32>
      %115 = vector.broadcast %114 : vector<1x128xf32> to vector<16x128xf32>
      %116 = arith.mulf %109, %115 : vector<16x128xf32>
      %c1_44 = arith.constant 1 : index
      %c0_45 = arith.constant 0 : index
      %117 = vector.load %arg4[%c1_44, %c0_45] : memref<3x128xf32, #tpu.memory_space<vmem>>, vector<1x128xf32>
      %118 = vector.broadcast %117 : vector<1x128xf32> to vector<16x128xf32>
      %119 = arith.mulf %116, %118 : vector<16x128xf32>
      %c2_46 = arith.constant 2 : index
      %c0_47 = arith.constant 0 : index
      %120 = vector.load %arg4[%c2_46, %c0_47] : memref<3x128xf32, #tpu.memory_space<vmem>>, vector<1x128xf32>
      %121 = vector.broadcast %120 : vector<1x128xf32> to vector<16x128xf32>
      %122 = arith.addf %119, %121 : vector<16x128xf32>
      %cst_48 = arith.constant 0.000000e+00 : f32
      %123 = vector.broadcast %cst_48 : f32 to vector<16x128xf32>
      %124 = arith.maximumf %122, %123 : vector<16x128xf32>
      %c0_49 = arith.constant 0 : index
      %c0_50 = arith.constant 0 : index
      %125 = vector.load %arg7[%c0_49, %c0_50] : memref<16x128xf32, #tpu.memory_space<vmem>>, vector<16x128xf32>
      tpu.vector_store %arg7[%c0_49, %c0_50], %124 {strides = array<i32>} : memref<16x128xf32, #tpu.memory_space<vmem>>, vector<16x128xf32>,
    } else {
    }
    return
  }
  func.func @transform_0(%arg0: i32) -> (i32, i32) {
    %c0_i32 = arith.constant 0 : i32
    %c0_i32_0 = arith.constant 0 : i32
    %c0_i32_1 = arith.constant 0 : i32
    return %c0_i32, %c0_i32_0 : i32, i32
  }
  func.func @transform_1(%arg0: i32) -> (i32, i32) {
    %c0_i32 = arith.constant 0 : i32
    %c0_i32_0 = arith.constant 0 : i32
    %c0_i32_1 = arith.constant 0 : i32
    return %c0_i32, %c0_i32_0 : i32, i32
  }
  func.func @transform_2(%arg0: i32) -> (i32, i32, i32) {
    %c0_i32 = arith.constant 0 : i32
    %c0_i32_0 = arith.constant 0 : i32
    %c0_i32_1 = arith.constant 0 : i32
    return %arg0, %c0_i32, %c0_i32_0 : i32, i32, i32
  }
  func.func @transform_3(%arg0: i32) -> (i32, i32) {
    %c0_i32 = arith.constant 0 : i32
    %c0_i32_0 = arith.constant 0 : i32
    %c0_i32_1 = arith.constant 0 : i32
    return %c0_i32, %c0_i32_0 : i32, i32
  }
  func.func @transform_4(%arg0: i32) -> (i32, i32) {
    %c0_i32 = arith.constant 0 : i32
    %c0_i32_0 = arith.constant 0 : i32
    %c0_i32_1 = arith.constant 0 : i32
    return %c0_i32, %c0_i32_0 : i32, i32
  }
  func.func @transform_5(%arg0: i32) -> (i32, i32) {
    %c0_i32 = arith.constant 0 : i32
    %c0_i32_0 = arith.constant 0 : i32
    %c0_i32_1 = arith.constant 0 : i32
    return %c0_i32, %c0_i32_0 : i32, i32
  }
  func.func @transform_6(%arg0: i32) -> (i32, i32) {
    %c0_i32 = arith.constant 0 : i32
    %c0_i32_0 = arith.constant 0 : i32
    %c0_i32_1 = arith.constant 0 : i32
    return %c0_i32, %c0_i32_0 : i32, i32
  }
}

</mosaic_0001>

<bundles_post_ra>
// kernel: tpu_custom_call.1
= control target key start
LH: loop header
LB: loop body
LE: loop exit
PB: predicated region body
PF: predicated region fallthrough
CT: control target
= control target key end

     0   :  { %11 = vsyncpa [#allocation5], 0  ;;  %s1572_s0 = inlined_call_operand.hbm [shape: f32[16,128], index: 0, kind: input, shape index: {}]   ;;  %s1573_s1 = inlined_call_operand.hbm [shape: f32[16,128], index: 1, kind: input, shape index: {}]   ;;  %s1574_s2 = inlined_call_operand.hbm [shape: f32[8,128,128], index: 2, kind: input, shape index: {}]   ;;  %s1575_s3 = inlined_call_operand.hbm [shape: f32[3,128], index: 3, kind: input, shape index: {}]   ;;  %s1576_s4 = inlined_call_operand.hbm [shape: f32[8,9], index: 4, kind: input, shape index: {}]   ;;  %s1577_s5 = inlined_call_operand.vmem [shape: f32[2,2], index: 5, kind: input, shape index: {}]   ;;  %s1578_s6 = inlined_call_operand.hbm [shape: f32[16,128], index: 6, kind: output, shape index: {}]  }
   0x1   :  { %12 = vsyncpa [#allocation10], 0 }
   0x2   :  { %13 = vsyncpa [#allocation7], 0 }
   0x3   :  { %14 = vsyncpa [#allocation8], 0 }
   0x4   :  { %15 = vsyncpa [#allocation6], 0  ;;  %s1328_s21 = smov 0   ;;  %s1330_s22 = smov 0  }
   0x5   :  { %s1332_s23 = smov 0   ;;  %s1334_s24 = smov 0  }
   0x6 LB: > { %s1347_s25 = sadd.s32 4294967295, %s1275_s24   ;;  %p83_p0 = scmp.ne.s32.totalorder %s1267_s22, %s1263_s21  ;;  %s1275_s24 = sphi %s1334_s24, %s1586_s24   ;;  %s1271_s23 = sphi %s1332_s23, %s1585_s23   ;;  %s1267_s22 = sphi %s1330_s22, %s1584_s22   ;;  %s1263_s21 = sphi %s1328_s21, %s1583_s21  }
   0x7   : > { %p84_p1 = scmp.eq.s32.totalorder %s1347_s25, 0  ;;  %p855_p2 = scmp.ge.s32.totalorder %s1275_s24, 1 }
   0x8   : > { %p178_p3 = scmp.lt.s32.totalorder %s1275_s24, 9  ;;  %p856_p4 = scmp.ne.s32.totalorder %s1347_s25, 0 }
   0x9   : > { %p1356_p5 = por %p84_p1, %p83_p0  ;;  %s189_s29 = sshll.u32 %s1572_s0, 4  ;;  %s190_s29 = int_to_ptr.hbm [resolvable:$true] %s189_s29 }
   0xa   : > { %p1363_p6 = pnand %p855_p2, %p178_p3  ;;  %s1277_s7 = smov [#allocation4]  }
   0xb   : > { %s191_s8 = sshll.u32 %s1277_s7, 4  ;;  %s203_s12 = sshll.u32 %s1573_s1, 4  ;;  %s192_s8 = int_to_ptr.vmem [resolvable:$true] %s191_s8  ;;  %s204_s12 = int_to_ptr.hbm [resolvable:$true] %s203_s12 }
   0xc   : > { %p937_p7 = pneg %p1363_p6  ;;  %s1278_s13 = smov 128  }
   0xd   : > { %s1279_s14 = smov 8   ;;  %s1280_s15 = smov [#allocation9]  }
   0xe   : > { %p1371_p8 = pnand %p937_p7, %p84_p1  ;;  %s205_s16 = sshll.u32 %s1280_s15, 4  ;;  %s206_s16 = int_to_ptr.vmem [resolvable:$true] %s205_s16 }
   0xf   : > { %s218_s19 = sshll.u32 %s1575_s3, 4  ;;  %s230_s27 = sshll.u32 %s1576_s4, 4  ;;  %s219_s19 = int_to_ptr.hbm [resolvable:$true] %s218_s19  ;;  %s231_s27 = int_to_ptr.hbm [resolvable:$true] %s230_s27 }
  0x10   : > { %940 = dma.hbm_to_vmem [thread:$0]  (!%p1371_p8), %s190_s29, 256, %s192_s8, [#allocation5], %s1278_s13, %s1278_s13, %s1279_s14  }
  0x11   : > { %943 = dma.hbm_to_vmem [thread:$0]  (!%p1371_p8), %s204_s12, 256, %s206_s16, [#allocation10], %s1278_s13, %s1278_s13, %s1279_s14  }
  0x12   : > { %s1281_s28 = smov [#allocation12]   ;;  %s1282_s7 = smov [#allocation13]  }
  0x13   : > { %s220_s29 = sshll.u32 %s1281_s28, 4  ;;  %s240_s11 = sshll.u32 %s1577_s5, 4  ;;  %s221_s29 = int_to_ptr.vmem [resolvable:$true] %s220_s29  ;;  %s241_s11 = int_to_ptr.vmem [resolvable:$true] %s240_s11 }
  0x14   : > { %946 = dma.hbm_to_vmem [thread:$0]  (!%p1371_p8), %s219_s19, 64, %s221_s29, [#allocation10]  }
  0x15   : > { %949 = dma.hbm_to_smem (!%p1371_p8), %s231_s27, 128, %s1282_s7, [#allocation7]  }
  0x16   : > { %s1283_s12 = smov [#allocation14]   ;;  %s1404_s15 = sadd.s32 1, %s1275_s24  }
  0x17   : > { %952 = dma.vmem_to_smem (!%p1371_p8), %s241_s11, 32, %s1283_s12, [#allocation8]  }
  0x18   : > { %s67_s16 = ssub.s32 %s1275_s24, %s1404_s15  ;;  %s70_s17 = sadd.s32 1, %s1271_s23 }
  0x19   : > { %p68_p9 = scmp.eq.s32.totalorder %s67_s16, 0  ;;  %p77_p10 = scmp.ne.s32.totalorder %s1271_s23, %s1267_s22 }
  0x1a   : > { %p78_p11 = scmp.eq.s32.totalorder %s1275_s24, 0  ;;  %p962_p13 = scmp.lt.s32.totalorder %s1275_s24, 8 }
  0x1b   : > { %s1413_s18 = scalar_select %p68_p9, %s1271_s23, %s70_s17  }
  0x1c   : > { %p79_p12 = por %p78_p11, %p77_p10  ;;  %s251_s19 = sand.u32 1, %s1275_s24  }
  0x1d   : > { %s253_s20 = sand.u32 1, %s1271_s23   ;;  %s882_s27 = sshll.u32 %s1275_s24, 7 }
  0x1e   : > { %s862_s21 = sshll.u32 %s253_s20, 7  ;;  %s260_s9 = scalar_lea.hbm %s1574_s2, %s882_s27 }
  0x1f   : > { %s261_s7 = sshll.u32 %s260_s9, 4  ;;  %s255_s8 = scalar_lea.vmem [#allocation11], %s862_s21  ;;  %s262_s7 = int_to_ptr.hbm [resolvable:$true] %s261_s7 }
  0x20   : > { %s263_s10 = sshll.u32 %s255_s8, 4  ;;  %p1422_p0 = pnand %p962_p13, %p79_p12  ;;  %s264_s10 = int_to_ptr.vmem [resolvable:$true] %s263_s10 }
  0x21   : > { %s252_s12 = scalar_lea.sflag [#allocation5], %s251_s19  ;;  %s1159_s16 = sshra.s32 %s262_s7, 4  ;;  %s1160_s16 = int_to_ptr.hbm [resolvable:$true] %s1159_s16 }
  0x22   : > { %s1161_s17 = scalar_lea.hbm %s1160_s16, 128  ;;  %p1163_p3 = pneg %p1422_p0 }
  0x23   : > { %p1162_p2 = scmp.ne.s32.totalorder %s1160_s16, %s1161_s17  ;;  %s1166_s21 = scalar_lea.hbm %s1574_s2, 1024 }
  0x24   : > { %p1167_p9 = scmp.lt.s32.totalorder %s1160_s16, %s1574_s2  ;;  %p1168_p10 = scmp.lt.s32.totalorder %s1166_s21, %s1161_s17 }
  0x25   : > { %p1164_p7 = pnand %p1163_p3, %p1162_p2 }
  0x26   : > { %p1169_p11 = por %p1168_p10, %p1167_p9 }
  0x27   : > { %p1165_p8 = pneg %p1164_p7 }
  0x29   : > { %p1170_p12 = pnand %p1169_p11, %p1165_p8 }
  0x2b   : > { %1173 = shalt.err (!%p1170_p12)
}
  0x2c   : > { %956 = dma.hbm_to_vmem [thread:$0]  (!%p1422_p0), %s262_s7, 2048, %s264_s10, %s252_s12, %s1278_s13, %s1278_s13, %s1279_s14  }
  0x2d   : > { %275 = sbr.rel (%p1363_p6) target bundleno = 869 (0x365), region = 44 }
  0x32   : > { %1234 = dma.done.wait (%p84_p1), [#allocation5], 256  }
  0x33   : > { %1236 = vsyncadd (%p84_p1), [#allocation5], 4294967040 }
  0x34   : > { %1238 = dma.done.wait (%p84_p1), [#allocation10], 256  }
  0x35   : > { %1240 = vsyncadd (%p84_p1), [#allocation10], 4294967040  ;;  %s287_s19 = sand.u32 1, %s1347_s25   ;;  %s289_s13 = sand.u32 1, %s1267_s22  }
  0x36   : > { %s868_s14 = sshll.u32 %s289_s13, 7  ;;  %s288_s30 = scalar_lea.sflag [#allocation5], %s287_s19 }
  0x37   : > { %s1451_s29 = scalar_lea.vmem [#allocation11], %s868_s14 }
  0x38   : > { %1242 = dma.done.wait (%p1356_p5), %s288_s30, 2048  }
  0x39   : > { %1244 = vsyncadd (%p1356_p5), %s288_s30, 4294965248 }
  0x3a   : > { %1246 = dma.done.wait (%p84_p1), [#allocation10], 64  }
  0x3b   : > { %1248 = vsyncadd (%p84_p1), [#allocation10], 4294967232 }
  0x3c   : > { %1250 = dma.done.wait (%p84_p1), [#allocation7], 128  }
  0x3d   : > { %1252 = vsyncadd (%p84_p1), [#allocation7], 4294967168 }
  0x3e   : > { %1254 = dma.done.wait (%p84_p1), [#allocation8], 32  }
  0x3f   : > { %1256 = vsyncadd (%p84_p1), [#allocation8], 4294967264 }
  0x40   : > { %312 = sfence }
  0x41   : > { %335 = sbr.rel (%p856_p4) target bundleno = 426 (0x1aa), region = 72  ;;  %s422_s10 = sld [smem:[#allocation14]] (!%p856_p4) }
  0x42   : > { %s1491_s11 = sld [smem:[#allocation14 + $0x1]] (!%p856_p4)  ;;  %s1285_s17 = smov (!%p856_p4), 127  }
  0x43   : > { %s1493_s12 = sld [smem:[#allocation14 + $0x80]] (!%p856_p4)  ;;  %s1286_s24 = smov (!%p856_p4), 1  }
  0x44   : > { %s1495_s16 = sld [smem:[#allocation14 + $0x81]] (!%p856_p4) }
  0x46   : > { %v336_v0 = vld [vmem:[#allocation4] sm:$0xff]  ;;  %v337_v1 = vld [vmem:[#allocation4 + $0x8] sm:$0xff]  ;;  %v1471_v2 = vld [vmem:[#allocation9] sm:$0xff]  ;;  %v1284_v42 = vmov 2048.0  }
  0x47   : > { %1018 = vtanh.f32 %v336_v0  ;;  %v1473_v3 = vld [vmem:[#allocation9 + $0x8] sm:$0xff]  ;;  %v390_v5 = vmul.f32 %v1471_v2, %v1471_v2 }
  0x48   : > { %1020 = vtanh.f32 %v337_v1  ;;  %v378_v4 = vadd.f32 %v1473_v3, %v1471_v2  ;;  %v391_v6 = vmul.f32 %v1473_v3, %v1473_v3 }
  0x49   : > { %1022 = vrcp.f32 %v1284_v42 }
  0x4a   : > { %379 = vadd.xlane.f32.xlu1 %v378_v4  ;;  %v392_v9 = vadd.f32 %v391_v6, %v390_v5 }
  0x4d   : > { %v1481_v7 = vpop.eup %1018 }
  0x4e   : > { %v1483_v8 = vpop.eup %1020  ;;  %v361_v11 = vmul.f32 %v1481_v7, %v1481_v7 }
  0x4f   : > { %v342_v10 = vadd.f32 %v1483_v8, %v1481_v7  ;;  %v362_v12 = vmul.f32 %v1483_v8, %v1483_v8  ;;  %v1023_v43 = vpop.eup %1022 }
  0x50   : > { %v354_v44 = vmul.f32 2048.0, %v1023_v43  ;;  %vm358_vm0 = vweird.f32 %v1023_v43 }
  0x51   : > { %343 = vadd.xlane.f32.xlu0 %v342_v10  ;;  %v363_v13 = vadd.f32 %v362_v12, %v361_v11 }
  0x52   : > { %393 = vadd.xlane.f32.xlu1 %v392_v9  ;;  %v355_v45 = vsub.f32 1.0, %v354_v44 }
  0x54   : > { %v356_v46 = vmul.f32 %v1023_v43, %v355_v45 }
  0x56   : > { %v357_v47 = vadd.f32 %v1023_v43, %v356_v46 }
  0x58   : > { %v359_v49 = vsel %vm358_vm0, %v1023_v43, %v357_v47 }
  0x59   : > { %364 = vadd.xlane.f32.xlu0 %v363_v13 }
  0xbd   : > { %v380_v14 = vpop.xlane.xlu1 %379 }
  0xbe   : > { %v381_v16 = vrot.slane %v380_v14, 4 }
  0xc0   : > { %v382_v21 = vadd.f32 %v381_v16, %v380_v14 }
  0xc2   : > { %v383_v26 = vrot.slane %v382_v21, 2 }
  0xc4   : > { %v344_v15 = vpop.xlane.xlu0 %343  ;;  %v384_v33 = vadd.f32 %v383_v26, %v382_v21 }
  0xc5   : > { %v345_v17 = vrot.slane %v344_v15, 4  ;;  %v394_v18 = vpop.xlane.xlu1 %393 }
  0xc6   : > { %v395_v19 = vrot.slane %v394_v18, 4  ;;  %v385_v37 = vrot.slane %v384_v33, 1 }
  0xc7   : > { %v346_v20 = vadd.f32 %v345_v17, %v344_v15 }
  0xc8   : > { %v396_v22 = vadd.f32 %v395_v19, %v394_v18  ;;  %v386_v41 = vadd.f32 %v385_v37, %v384_v33  ;;  %v423_v19 = vstv %s422_s10 }
  0xc9   : > { %v347_v23 = vrot.slane %v346_v20, 2 }
  0xca   : > { %v397_v24 = vrot.slane %v396_v22, 2 }
  0xcb   : > { %v348_v25 = vadd.f32 %v347_v23, %v346_v20 }
  0xcc   : > { %v365_v27 = vpop.xlane.xlu0 %364  ;;  %v398_v32 = vadd.f32 %v397_v24, %v396_v22 }
  0xcd   : > { %v366_v28 = vrot.slane %v365_v27, 4  ;;  %v349_v29 = vrot.slane %v348_v25, 1 }
  0xce   : > { %v399_v36 = vrot.slane %v398_v32, 1 }
  0xcf   : > { %v367_v30 = vadd.f32 %v366_v28, %v365_v27  ;;  %v350_v31 = vadd.f32 %v349_v29, %v348_v25  ;;  %v427_v25 = vstv %s1491_s11  ;;  %v446_v27 = vstv %s1493_s12 }
  0xd0   : > { %v400_v40 = vadd.f32 %v399_v36, %v398_v32  ;;  %v450_v32 = vstv %s1495_s16 }
  0xd1   : > { %v368_v34 = vrot.slane %v367_v30, 2  ;;  %899 = vpush %v350_v31 }
  0xd3   : > { %v369_v35 = vadd.f32 %v368_v34, %v367_v30 }
  0xd5   : > { %v370_v38 = vrot.slane %v369_v35, 1 }
  0xd7   : > { %v371_v39 = vadd.f32 %v370_v38, %v369_v35  ;;  %v453_v35 = vlaneseq }
  0xd9   : > { %901 = vpush %v371_v39  ;;  %v454_v36 = vand.u32 127, %v453_v35 }
  0xda   : > { %903 = vpush %v386_v41 }
  0xdb   : > { %905 = vpush %v400_v40  ;;  %v459_v37 = vadd.s32 4294967295, %v454_v36  ;;  %v1287_v40 = vmov 0.0   ;;  %v474_v45 = vadd.s32 1, %v454_v36 }
  0xdc   : > { %504 = vst [vmem:[#allocation3 + $0x8] sm:$0xff] %v1287_v40 }
  0xdd   : > { %vm460_vm7 = vcmp.ge.s32.totalorder %v459_v37, 0  ;;  %505 = vst [vmem:[#allocation3] sm:$0xff] %v1287_v40  ;;  %vm476_vm8 = vcmp.lt.s32.totalorder %v474_v45, 128 }
 0x102   : > { %s900_s26 = spop %899 }
 0x103   : > { %v352_v48 = vstv %s900_s26 }
 0x104   : > { %v360_v50 = vmul.f32 %v359_v49, %v352_v48 }
 0x106   : > { %v375_v53 = vmul.f32 %v360_v50, %v360_v50  ;;  %v407_v15 = vsub.f32 %v1481_v7, %v360_v50  ;;  %v408_v16 = vsub.f32 %v1483_v8, %v360_v50 }
 0x10a   : > { %s902_s9 = spop %901 }
 0x10b   : > { %v373_v51 = vstv %s902_s9  ;;  %s904_s7 = spop %903 }
 0x10c   : > { %v374_v52 = vmul.f32 %v373_v51, %v359_v49  ;;  %v388_v54 = vstv %s904_s7  ;;  %s906_s8 = spop %905 }
 0x10d   : > { %v389_v55 = vmul.f32 %v388_v54, %v359_v49  ;;  %v402_v56 = vstv %s906_s8 }
 0x10e   : > { %v376_v57 = vsub.f32 %v374_v52, %v375_v53  ;;  %v403_v58 = vmul.f32 %v402_v56, %v359_v49 }
 0x10f   : > { %v404_v59 = vmul.f32 %v389_v55, %v389_v55  ;;  %v430_v23 = vsub.f32 %v1471_v2, %v389_v55  ;;  %v431_v24 = vsub.f32 %v1473_v3, %v389_v55 }
 0x110   : > { %v377_v60 = vmax.f32 %v376_v57, 0.0 }
 0x111   : > { %v405_v61 = vsub.f32 %v403_v58, %v404_v59 }
 0x112   : > { %v409_v62 = vadd.f32 1e-05, %v377_v60 }
 0x113   : > { %v406_v63 = vmax.f32 %v405_v61, 0.0 }
 0x114   : > { %1024 = vrsqrt.f32 %v409_v62  ;;  %vm416_vm2 = vweird.f32 %v409_v62 }
 0x115   : > { %v432_v0 = vadd.f32 1e-05, %v406_v63 }
 0x117   : > { %1026 = vrsqrt.f32 %v432_v0  ;;  %vm439_vm5 = vweird.f32 %v432_v0 }
 0x11a   : > { %v1025_v1 = vpop.eup %1024 }
 0x11b   : > { %v411_v4 = vmul.f32 %v1025_v1, %v409_v62  ;;  %vm417_vm1 = vweird.f32 %v1025_v1 }
 0x11c   : > { %vm418_vm3 = vmor %vm416_vm2, %vm417_vm1 }
 0x11d   : > { %v1027_v5 = vpop.eup %1026  ;;  %v412_v6 = vmul.f32 %v1025_v1, %v411_v4 }
 0x11e   : > { %v434_v9 = vmul.f32 %v1027_v5, %v432_v0  ;;  %vm440_vm4 = vweird.f32 %v1027_v5 }
 0x11f   : > { %v413_v10 = vmul.f32 0.5, %v412_v6  ;;  %vm441_vm6 = vmor %vm439_vm5, %vm440_vm4 }
 0x120   : > { %v435_v11 = vmul.f32 %v1027_v5, %v434_v9 }
 0x121   : > { %v414_v12 = vsub.f32 1.5, %v413_v10 }
 0x122   : > { %v436_v13 = vmul.f32 0.5, %v435_v11 }
 0x123   : > { %v415_v14 = vmul.f32 %v1025_v1, %v414_v12 }
 0x124   : > { %v437_v17 = vsub.f32 1.5, %v436_v13 }
 0x125   : > { %v419_v18 = vsel %vm418_vm3, %v1025_v1, %v415_v14 }
 0x126   : > { %v438_v20 = vmul.f32 %v1027_v5, %v437_v17  ;;  %v421_v21 = vmul.f32 %v419_v18, %v408_v16  ;;  %v420_v22 = vmul.f32 %v419_v18, %v407_v15 }
 0x128   : > { %v425_v7 = vmul.f32 %v423_v19, %v421_v21  ;;  %v424_v26 = vmul.f32 %v423_v19, %v420_v22  ;;  %v442_v8 = vsel %vm441_vm6, %v1027_v5, %v438_v20 }
 0x129   : > { %v444_v28 = vmul.f32 %v442_v8, %v431_v24  ;;  %v443_v29 = vmul.f32 %v442_v8, %v430_v23 }
 0x12a   : > { %v429_v30 = vadd.f32 %v427_v25, %v425_v7  ;;  %v428_v31 = vadd.f32 %v427_v25, %v424_v26 }
 0x12b   : > { %v448_v33 = vmul.f32 %v446_v27, %v444_v28  ;;  %v447_v34 = vmul.f32 %v446_v27, %v443_v29 }
 0x12c   : > { %472 = vrot.lane.b32.xlu1 %v429_v30, %s1285_s17  ;;  %469 = vst [vmem:[#allocation2 + $0x18] sm:$0xff] %v429_v30  ;;  %470 = vrot.lane.b32.xlu0 %v428_v31, %s1285_s17 }
 0x12d   : > { %468 = vst [vmem:[#allocation2 + $0x58] sm:$0xff] %v428_v31  ;;  %455 = vrot.lane.b32.xlu2 %v428_v31, %s1286_s24  ;;  %v452_v2 = vadd.f32 %v450_v32, %v448_v33  ;;  %v451_v3 = vadd.f32 %v450_v32, %v447_v34 }
 0x12f   : > { %494 = vst [vmem:[#allocation2 + $0x48] sm:$0xff] %v452_v2 }
 0x130   : > { %493 = vst [vmem:[#allocation2 + $0x28] sm:$0xff] %v451_v3 }
 0x134   : > { %497 = vrot.lane.b32.xlu0 %v452_v2, %s1285_s17 }
 0x135   : > { %457 = vrot.lane.b32.xlu2 %v429_v30, %s1286_s24 }
 0x13d   : > { %483 = vrot.lane.b32.xlu2 %v451_v3, %s1286_s24 }
 0x145   : > { %485 = vrot.lane.b32.xlu2 %v452_v2, %s1286_s24 }
 0x14d   : > { %495 = vrot.lane.b32.xlu2 %v451_v3, %s1285_s17 }
 0x187   : > { %v456_v38 = vpop.permute.xlu2 %455 }
 0x188   : > { %v463_v39 = vsel %vm460_vm7, %v456_v38, 0.0 }
 0x189   : > { %465 = vst [vmem:[#allocation2 + $0x30] sm:$0xff] %v463_v39 }
 0x18f   : > { %v458_v41 = vpop.permute.xlu2 %457 }
 0x190   : > { %v464_v42 = vsel %vm460_vm7, %v458_v41, 0.0 }
 0x191   : > { %466 = vst [vmem:[#allocation2] sm:$0xff] %v464_v42 }
 0x197   : > { %v484_v43 = vpop.permute.xlu2 %483 }
 0x198   : > { %v487_v44 = vsel %vm460_vm7, %v484_v43, 0.0 }
 0x199   : > { %490 = vst [vmem:[#allocation2 + $0x8] sm:$0xff] %v487_v44 }
 0x19e   : > { %v473_v46 = vpop.permute.xlu1 %472  ;;  %v471_v47 = vpop.permute.xlu0 %470 }
 0x19f   : > { %v479_v48 = vsel %vm476_vm8, %v473_v46, 0.0  ;;  %v478_v49 = vsel %vm476_vm8, %v471_v47, 0.0  ;;  %v486_v50 = vpop.permute.xlu2 %485 }
 0x1a0   : > { %482 = vst [vmem:[#allocation2 + $0x20] sm:$0xff] %v479_v48  ;;  %v488_v51 = vsel %vm460_vm7, %v486_v50, 0.0 }
 0x1a1   : > { %481 = vst [vmem:[#allocation2 + $0x50] sm:$0xff] %v478_v49 }
 0x1a2   : > { %491 = vst [vmem:[#allocation2 + $0x38] sm:$0xff] %v488_v51 }
 0x1a6   : > { %v498_v52 = vpop.permute.xlu0 %497 }
 0x1a7   : > { %v500_v53 = vsel %vm476_vm8, %v498_v52, 0.0  ;;  %v496_v54 = vpop.permute.xlu2 %495 }
 0x1a8   : > { %503 = vst [vmem:[#allocation2 + $0x40] sm:$0xff] %v500_v53  ;;  %v499_v55 = vsel %vm476_vm8, %v496_v54, 0.0 }
 0x1a9   : > { %502 = vst [vmem:[#allocation2 + $0x10] sm:$0xff] %v499_v55 }
 0x1aa PF: > { %s1509_s20 = sshll.u32 %s1347_s25, 7  ;;  %v506_v56 = vld [vmem:[#allocation2 + $0x30] sm:$0xff]  ;;  %v507_v57 = vld [vmem:[#allocation2] sm:$0xff]  ;;  %v514_v58 = vld [vmem:[#allocation2 + $0x58] sm:$0xff]  ;;  %v1288_v53 = vmov 2048.0   ;;  %p877_p1 = scmp.ne.s32.totalorder %s1347_s25, 7 }
 0x1ab   : > { %s509_s21 = sld [smem:[#allocation13 + %s1509_s20]]  ;;  %s516_s27 = sadd.s32 1, %s1509_s20  ;;  %v515_v59 = vld [vmem:[#allocation2 + $0x18] sm:$0xff]  ;;  %v524_v61 = vld [vmem:[#allocation2 + $0x50] sm:$0xff]  ;;  %v525_v62 = vld [vmem:[#allocation2 + $0x20] sm:$0xff]  ;;  %1028 = vrcp.f32 %v1288_v53 }
 0x1ac   : > { %s517_s28 = sld [smem:[#allocation13 + %s516_s27]]  ;;  %s526_s19 = sadd.s32 2, %s1509_s20  ;;  %v534_v4 = vld [vmem:[#allocation2 + $0x8] sm:$0xff]  ;;  %v535_v5 = vld [vmem:[#allocation2 + $0x38] sm:$0xff]  ;;  %v647_v55 = vld [vmem:[%s1451_s29 + $0x70] sm:$0xff] }
 0x1ad   : > { %s527_s13 = sld [smem:[#allocation13 + %s526_s19]]  ;;  %s536_s14 = sadd.s32 3, %s1509_s20  ;;  %v544_v14 = vld [vmem:[#allocation2 + $0x28] sm:$0xff] }
 0x1ae   : > { %s537_s30 = sld [smem:[#allocation13 + %s536_s14]]  ;;  %s546_s26 = sadd.s32 4, %s1509_s20  ;;  %v545_v15 = vld [vmem:[#allocation2 + $0x48] sm:$0xff] }
 0x1af   : > { %s1516_s9 = sld [smem:[#allocation13 + %s546_s26]]  ;;  %s556_s7 = sadd.s32 5, %s1509_s20  ;;  %v555_v22 = vld [vmem:[#allocation2 + $0x40] sm:$0xff]  ;;  %v648_v54 = vld [vmem:[%s1451_s29 + $0x78] sm:$0xff] }
 0x1b0   : > { %s1519_s8 = sld [smem:[#allocation13 + %s556_s7]]  ;;  %s563_s10 = sadd.s32 6, %s1509_s20  ;;  %v554_v21 = vld [vmem:[#allocation2 + $0x10] sm:$0xff]  ;;  %649 = vmatpush.msra.mxu0 %v648_v54  ;;  %883 = vmatpush.msra.mxu1 %v648_v54 }
 0x1b1   : > { %v510_v60 = vstv %s509_s21  ;;  %s564_s11 = sld [smem:[#allocation13 + %s563_s10]]  ;;  %s619_s17 = sadd.s32 7, %s1509_s20 }
 0x1b2   : > { %v511_v63 = vmul.f32 %v510_v60, %v506_v56  ;;  %v512_v0 = vmul.f32 %v510_v60, %v507_v57  ;;  %v518_v1 = vstv %s517_s28  ;;  %650 = vmatpush.msra.mxu0 %v647_v55  ;;  %884 = vmatpush.msra.mxu1 %v647_v55  ;;  %v1029_v56 = vpop.eup %1028  ;;  %v646_v57 = vld [vmem:[%s1451_s29 + $0x68] sm:$0xff]  ;;  %v644_v60 = vld [vmem:[%s1451_s29 + $0x58] sm:$0xff]  ;;  %s624_s24 = sadd.s32 8, %s1509_s20  ;;  %s620_s21 = sld [smem:[#allocation13 + %s619_s17]] }
 0x1b3   : > { %v519_v6 = vmul.f32 %v518_v1, %v514_v58  ;;  %v520_v9 = vmul.f32 %v518_v1, %v515_v59  ;;  %v528_v10 = vstv %s527_s13  ;;  %v645_v58 = vld [vmem:[%s1451_s29 + $0x60] sm:$0xff]  ;;  %v580_v59 = vmul.f32 2048.0, %v1029_v56  ;;  %s625_s27 = sld [smem:[#allocation13 + %s624_s24]] }
 0x1b4   : > { %v529_v11 = vmul.f32 %v528_v10, %v524_v61  ;;  %v530_v12 = vmul.f32 %v528_v10, %v525_v62  ;;  %v538_v13 = vstv %s537_s30  ;;  %651 = vmatpush.msra.mxu0 %v646_v57  ;;  %885 = vmatpush.msra.mxu1 %v646_v57  ;;  %v643_v61 = vld [vmem:[%s1451_s29 + $0x50] sm:$0xff]  ;;  %vm584_vm9 = vweird.f32 %v1029_v56  ;;  %v637_v10 = vld [vmem:[%s1451_s29 + $0x20] sm:$0xff] }
 0x1b5   : > { %v521_v16 = vadd.f32 %v519_v6, %v511_v63  ;;  %v522_v17 = vadd.f32 %v520_v9, %v512_v0  ;;  %v539_v18 = vmul.f32 %v538_v13, %v534_v4  ;;  %v540_v19 = vmul.f32 %v538_v13, %v535_v5  ;;  %v642_v63 = vld [vmem:[%s1451_s29 + $0x48] sm:$0xff]  ;;  %v641_v0 = vld [vmem:[%s1451_s29 + $0x40] sm:$0xff]  ;;  %v640_v4 = vld [vmem:[%s1451_s29 + $0x38] sm:$0xff] }
 0x1b6   : > { %v548_v20 = vstv %s1516_s9  ;;  %v558_v23 = vstv %s1519_s8  ;;  %652 = vmatpush.msra.mxu0 %v645_v58  ;;  %886 = vmatpush.msra.mxu1 %v645_v58  ;;  %v581_v62 = vsub.f32 1.0, %v580_v59  ;;  %v639_v5 = vld [vmem:[%s1451_s29 + $0x30] sm:$0xff]  ;;  %v638_v9 = vld [vmem:[%s1451_s29 + $0x28] sm:$0xff] }
 0x1b7   : > { %v531_v24 = vadd.f32 %v529_v11, %v521_v16  ;;  %v532_v25 = vadd.f32 %v530_v12, %v522_v17  ;;  %v549_v7 = vmul.f32 %v548_v20, %v544_v14  ;;  %v550_v26 = vmul.f32 %v548_v20, %v545_v15  ;;  %v636_v11 = vld [vmem:[%s1451_s29 + $0x18] sm:$0xff]  ;;  %v635_v14 = vld [vmem:[%s1451_s29 + $0x10] sm:$0xff]  ;;  %v634_v16 = vld [vmem:[%s1451_s29 + $0x8] sm:$0xff] }
 0x1b8   : > { %v559_v28 = vmul.f32 %v558_v23, %v554_v21  ;;  %v560_v29 = vmul.f32 %v558_v23, %v555_v22  ;;  %v565_v32 = vstv %s564_s11  ;;  %653 = vmatpush.msra.mxu0 %v644_v60  ;;  %887 = vmatpush.msra.mxu1 %v644_v60  ;;  %v582_v1 = vmul.f32 %v1029_v56, %v581_v62  ;;  %v633_v17 = vld [vmem:[%s1451_s29] sm:$0xff] }
 0x1b9   : > { %v541_v8 = vadd.f32 %v539_v18, %v531_v24  ;;  %v542_v27 = vadd.f32 %v540_v19, %v532_v25 }
 0x1ba   : > { %654 = vmatpush.msra.mxu0 %v643_v61  ;;  %888 = vmatpush.msra.mxu1 %v643_v61  ;;  %v583_v6 = vadd.f32 %v1029_v56, %v582_v1 }
 0x1bb   : > { %v551_v30 = vadd.f32 %v549_v7, %v541_v8  ;;  %v552_v31 = vadd.f32 %v550_v26, %v542_v27 }
 0x1bc   : > { %655 = vmatpush.msra.mxu0 %v642_v63  ;;  %889 = vmatpush.msra.mxu1 %v642_v63  ;;  %v585_v13 = vsel %vm584_vm9, %v1029_v56, %v583_v6 }
 0x1bd   : > { %v561_v33 = vadd.f32 %v559_v28, %v551_v30  ;;  %v562_v34 = vadd.f32 %v560_v29, %v552_v31  ;;  %v621_v31 = vstv %s620_s21 }
 0x1be   : > { %656 = vmatpush.msra.mxu0 %v641_v0  ;;  %890 = vmatpush.msra.mxu1 %v641_v0 }
 0x1bf   : > { %v1524_v2 = vadd.f32 %v565_v32, %v561_v33  ;;  %v1526_v3 = vadd.f32 %v565_v32, %v562_v34  ;;  %v626_v34 = vstv %s625_s27 }
 0x1c0   : > { %657 = vmatpush.msra.mxu0 %v640_v4  ;;  %891 = vmatpush.msra.mxu1 %v640_v4 }
 0x1c1   : > { %v568_v35 = vadd.f32 %v1526_v3, %v1524_v2  ;;  %v587_v36 = vmul.f32 %v1524_v2, %v1524_v2  ;;  %v588_v37 = vmul.f32 %v1526_v3, %v1526_v3 }
 0x1c2   : > { %658 = vmatpush.msra.mxu0 %v639_v5  ;;  %892 = vmatpush.msra.mxu1 %v639_v5 }
 0x1c3   : > { %569 = vadd.xlane.f32.xlu0 %v568_v35  ;;  %v589_v38 = vadd.f32 %v588_v37, %v587_v36 }
 0x1c4   : > { %659 = vmatpush.msra.mxu0 %v638_v9  ;;  %893 = vmatpush.msra.mxu1 %v638_v9 }
 0x1c6   : > { %660 = vmatpush.msra.mxu0 %v637_v10  ;;  %894 = vmatpush.msra.mxu1 %v637_v10 }
 0x1c8   : > { %661 = vmatpush.msra.mxu0 %v636_v11  ;;  %895 = vmatpush.msra.mxu1 %v636_v11 }
 0x1ca   : > { %662 = vmatpush.msra.mxu0 %v635_v14  ;;  %896 = vmatpush.msra.mxu1 %v635_v14 }
 0x1cb   : > { %590 = vadd.xlane.f32.xlu0 %v589_v38 }
 0x1cc   : > { %663 = vmatpush.msra.mxu0 %v634_v16  ;;  %897 = vmatpush.msra.mxu1 %v634_v16 }
 0x1ce   : > { %664 = vmatpush.msra.mxu0 %v633_v17  ;;  %898 = vmatpush.msra.mxu1 %v633_v17 }
 0x236   : > { %v570_v39 = vpop.xlane.xlu0 %569 }
 0x237   : > { %v571_v40 = vrot.slane %v570_v39, 4 }
 0x239   : > { %v572_v41 = vadd.f32 %v571_v40, %v570_v39 }
 0x23b   : > { %v573_v42 = vrot.slane %v572_v41, 2 }
 0x23d   : > { %v574_v43 = vadd.f32 %v573_v42, %v572_v41  ;;  %v631_v41 = vld [vmem:[#allocation3 + $0x8] sm:$0xff]  ;;  %v632_v42 = vld [vmem:[#allocation3] sm:$0xff] }
 0x23e   : > { %v591_v44 = vpop.xlane.xlu0 %590 }
 0x23f   : > { %v592_v45 = vrot.slane %v591_v44, 4  ;;  %v575_v46 = vrot.slane %v574_v43, 1 }
 0x241   : > { %v593_v47 = vadd.f32 %v592_v45, %v591_v44  ;;  %v576_v48 = vadd.f32 %v575_v46, %v574_v43 }
 0x243   : > { %v594_v49 = vrot.slane %v593_v47, 2  ;;  %907 = vpush %v576_v48 }
 0x245   : > { %v595_v50 = vadd.f32 %v594_v49, %v593_v47 }
 0x247   : > { %v596_v51 = vrot.slane %v595_v50, 1 }
 0x249   : > { %v597_v52 = vadd.f32 %v596_v51, %v595_v50 }
 0x24b   : > { %909 = vpush %v597_v52 }
 0x274   : > { %s908_s12 = spop %907 }
 0x275   : > { %v578_v12 = vstv %s908_s12 }
 0x276   : > { %v586_v15 = vmul.f32 %v585_v13, %v578_v12 }
 0x278   : > { %v601_v20 = vmul.f32 %v586_v15, %v586_v15  ;;  %v604_v28 = vsub.f32 %v1524_v2, %v586_v15  ;;  %v605_v29 = vsub.f32 %v1526_v3, %v586_v15 }
 0x27c   : > { %s910_s16 = spop %909 }
 0x27d   : > { %v599_v18 = vstv %s910_s16 }
 0x27e   : > { %v600_v19 = vmul.f32 %v599_v18, %v585_v13 }
 0x280   : > { %v602_v21 = vsub.f32 %v600_v19, %v601_v20 }
 0x282   : > { %v603_v22 = vmax.f32 %v602_v21, 0.0 }
 0x284   : > { %v606_v23 = vadd.f32 1e-05, %v603_v22 }
 0x286   : > { %1030 = vrsqrt.f32 %v606_v23  ;;  %vm613_vm11 = vweird.f32 %v606_v23 }
 0x28c   : > { %v1031_v24 = vpop.eup %1030 }
 0x28d   : > { %v608_v25 = vmul.f32 %v1031_v24, %v606_v23  ;;  %vm614_vm10 = vweird.f32 %v1031_v24 }
 0x28e   : > { %vm615_vm12 = vmor %vm613_vm11, %vm614_vm10 }
 0x28f   : > { %v609_v7 = vmul.f32 %v1031_v24, %v608_v25 }
 0x291   : > { %v610_v26 = vmul.f32 0.5, %v609_v7 }
 0x293   : > { %v611_v8 = vsub.f32 1.5, %v610_v26 }
 0x295   : > { %v612_v27 = vmul.f32 %v1031_v24, %v611_v8 }
 0x297   : > { %v616_v30 = vsel %vm615_vm12, %v1031_v24, %v612_v27 }
 0x298   : > { %v617_v32 = vmul.f32 %v616_v30, %v604_v28  ;;  %v618_v33 = vmul.f32 %v616_v30, %v605_v29 }
 0x29a   : > { %v622_v35 = vmul.f32 %v621_v31, %v617_v32  ;;  %v623_v36 = vmul.f32 %v621_v31, %v618_v33 }
 0x29c   : > { %v627_v37 = vadd.f32 %v626_v34, %v622_v35  ;;  %v628_v38 = vadd.f32 %v626_v34, %v623_v36 }
 0x29e   : > { %v629_v39 = vmax.f32 %v627_v37, 0.0  ;;  %v630_v40 = vmax.f32 %v628_v38, 0.0 }
 0x2a0   : > { %665 = vmatmul.f32.vlgmr.msra.gmra.mxu0 %v629_v39  ;;  %668 = vmatmul.f32.vlgmr.msra.gmra.mxu1 %v630_v40 }
 0x31d   : > { %v666_v43 = vpop.f32.mrf.mxu0  ;;  %v669_v2 = vpop.f32.mrf.mxu1  ;;  %679 = sbr.rel (%p877_p1) target bundleno = 863 (0x35f), region = 76 }
 0x31e   : > { %v672_v44 = vadd.f32 %v666_v43, %v631_v41  ;;  %v673_v3 = vadd.f32 %v669_v2, %v632_v42 }
 0x320   : > { %674 = vst [vmem:[#allocation3 + $0x8] sm:$0xff] %v672_v44 }
 0x321   : > { %675 = vst [vmem:[#allocation3] sm:$0xff] %v673_v3 }
 0x322   : > { %v1032_v47 = vld [vmem:[#allocation12] ss:$0 sm:$0xff]  ;;  %v1289_v48 = vmov 16.0   ;;  %v1033_v26 = vld [vmem:[#allocation12 + $0x1] ss:$0 sm:$0xff] }
 0x323   : > { %1035 = vrcp.f32 %v1289_v48  ;;  %v1034_v28 = vld [vmem:[#allocation12 + $0x2] ss:$0 sm:$0xff] }
 0x327   : > { %v680_v45 = vld [vmem:[#allocation3 + $0x8] sm:$0xff] }
 0x328   : > { %v681_v46 = vld [vmem:[#allocation3] sm:$0xff]  ;;  %v684_v49 = vadd.f32 %v1032_v47, %v680_v45 }
 0x329   : > { %v685_v50 = vadd.f32 %v1032_v47, %v681_v46  ;;  %v1036_v54 = vpop.eup %1035 }
 0x32a   : > { %v701_v52 = vmul.f32 %v684_v49, %v684_v49  ;;  %v694_v57 = vmul.f32 16.0, %v1036_v54  ;;  %vm698_vm13 = vweird.f32 %v1036_v54 }
 0x32b   : > { %v686_v51 = vadd.f32 %v685_v50, %v684_v49  ;;  %v702_v53 = vmul.f32 %v685_v50, %v685_v50 }
 0x32c   : > { %v695_v60 = vsub.f32 1.0, %v694_v57 }
 0x32d   : > { %v687_v55 = vrot.slane %v686_v51, 4  ;;  %v703_v56 = vadd.f32 %v702_v53, %v701_v52 }
 0x32e   : > { %v696_v63 = vmul.f32 %v1036_v54, %v695_v60 }
 0x32f   : > { %v688_v58 = vadd.f32 %v687_v55, %v686_v51  ;;  %v704_v59 = vrot.slane %v703_v56, 4 }
 0x330   : > { %v697_v4 = vadd.f32 %v1036_v54, %v696_v63 }
 0x331   : > { %v689_v61 = vrot.slane %v688_v58, 2  ;;  %v705_v62 = vadd.f32 %v704_v59, %v703_v56 }
 0x332   : > { %v699_v9 = vsel %vm698_vm13, %v1036_v54, %v697_v4 }
 0x333   : > { %v690_v0 = vadd.f32 %v689_v61, %v688_v58  ;;  %v706_v1 = vrot.slane %v705_v62, 2 }
 0x335   : > { %v691_v5 = vrot.slane %v690_v0, 1  ;;  %v707_v6 = vadd.f32 %v706_v1, %v705_v62 }
 0x337   : > { %v692_v10 = vadd.f32 %v691_v5, %v690_v0  ;;  %v708_v11 = vrot.slane %v707_v6, 1 }
 0x339   : > { %v700_v12 = vmul.f32 %v699_v9, %v692_v10  ;;  %v709_v13 = vadd.f32 %v708_v11, %v707_v6 }
 0x33b   : > { %v710_v14 = vmul.f32 %v709_v13, %v699_v9  ;;  %v711_v15 = vmul.f32 %v700_v12, %v700_v12  ;;  %v713_v24 = vsub.f32 %v684_v49, %v700_v12  ;;  %v714_v25 = vsub.f32 %v685_v50, %v700_v12 }
 0x33d   : > { %v712_v16 = vsub.f32 %v710_v14, %v711_v15 }
 0x33f   : > { %v715_v17 = vmax.f32 %v712_v16, 0.0 }
 0x341   : > { %v716_v18 = vadd.f32 1e-05, %v715_v17 }
 0x343   : > { %1037 = vrsqrt.f32 %v716_v18  ;;  %vm723_vm14 = vweird.f32 %v716_v18 }
 0x349   : > { %v1038_v19 = vpop.eup %1037 }
 0x34a   : > { %v718_v20 = vmul.f32 %v1038_v19, %v716_v18  ;;  %vm724_vm15 = vweird.f32 %v1038_v19 }
 0x34b   : > { %vm725_vm0 = vmor %vm723_vm14, %vm724_vm15 }
 0x34c   : > { %v719_v21 = vmul.f32 %v1038_v19, %v718_v20 }
 0x34e   : > { %v720_v22 = vmul.f32 0.5, %v719_v21 }
 0x350   : > { %v721_v23 = vsub.f32 1.5, %v720_v22 }
 0x352   : > { %v722_v7 = vmul.f32 %v1038_v19, %v721_v23 }
 0x354   : > { %v726_v8 = vsel %vm725_vm0, %v1038_v19, %v722_v7 }
 0x355   : > { %v727_v27 = vmul.f32 %v726_v8, %v713_v24  ;;  %v728_v29 = vmul.f32 %v726_v8, %v714_v25 }
 0x357   : > { %v731_v30 = vmul.f32 %v1033_v26, %v727_v27  ;;  %v732_v31 = vmul.f32 %v1033_v26, %v728_v29 }
 0x359   : > { %v735_v32 = vadd.f32 %v1034_v28, %v731_v30  ;;  %v736_v33 = vadd.f32 %v1034_v28, %v732_v31 }
 0x35b   : > { %v737_v34 = vmax.f32 %v735_v32, 0.0  ;;  %v738_v35 = vmax.f32 %v736_v33, 0.0 }
 0x35d   : > { %739 = vst [vmem:[#allocation15] sm:$0xff] %v737_v34 }
 0x35e   : > { %740 = vst [vmem:[#allocation15 + $0x8] sm:$0xff] %v738_v35 }
 0x35f PF: > { %p968_p4 = scmp.eq.s32.totalorder %s1347_s25, 7  ;;  %s1290_s29 = smov [#allocation15]  }
 0x360   : > { %s746_s20 = sshll.u32 %s1290_s29, 4  ;;  %s748_s13 = sshll.u32 %s1578_s6, 4  ;;  %s747_s20 = int_to_ptr.vmem [resolvable:$true] %s746_s20  ;;  %s749_s13 = int_to_ptr.hbm [resolvable:$true] %s748_s13 }
 0x361   : > { %s1291_s14 = smov 128   ;;  %s1292_s30 = smov 8  }
 0x362   : > { %934 = dma.vmem_to_hbm [thread:$0]  (%p968_p4), %s747_s20, 256, %s749_s13, [#allocation6], %s1291_s14, %s1291_s14, %s1292_s30  }
 0x363   : > { %1258 = dma.done.wait (%p968_p4), [#allocation6], 256  }
 0x364   : > { %1260 = vsyncadd (%p968_p4), [#allocation6], 4294967040 }
 0x365 PF: > { %p18_p5 = scmp.ge.s32.totalorder %s1404_s15, 10   ;;  %s1583_s21 = smov %s1267_s22 }
 0x366   : > { %s1584_s22 = smov %s1271_s23  ;;  %s1585_s23 = smov %s1413_s18 }
 0x367   : > { %s1586_s24 = smov %s1404_s15  ;;  %20 = sbr.rel (!%p18_p5) target bundleno = 6 (0x6), region = 120 }
 0x36c   :  { %765 = vsyncpa [#allocation5], 1 }
 0x36d   :  { %767 = vsyncpa [#allocation5 + $0x1], 1 }
 0x36e   :  { %768 = vsyncpa [#allocation10], 1 }
 0x36f   :  { %769 = vsyncpa [#allocation6], 1 }
 0x370   :  { %771 = vsyncpa [#allocation6 + $0x1], 1 }
 0x371   :  { %772 = vsyncpa [#allocation7], 1 }
 0x372   :  { %774 = vsyncpa [#allocation7 + $0x1], 1 }
 0x373   :  { %775 = vsyncpa [#allocation8], 1 }
 0x374   :  { %777 = vsyncpa [#allocation8 + $0x1], 1 }

</bundles_post_ra>
